<compile_context>
chip_gen: v7x
topology: tpu7x:2x2x1
jax: 0.10.0
libtpu: 0.0.40
codegen_flags: <defaults>
</compile_context>

<pallas_src>
import jax
import jax.numpy as jnp
from jax import lax
from jax.experimental import pallas as pl
from jax.experimental.pallas import tpu as pltpu


IN_FEATURES = 230
HEAD_OUT = 8          # packed output lanes: [logits 0:3 | params 3:6 | zero 6:8]


def _round_up(x, m):
    return (x + m - 1) // m * m


def _pick_batch_tile(B, block_b):
    """Batch tile: multiple of 8 (or the full batch) with >=2 grid steps when B > 8."""
    if B <= 8:
        return B                          # single full-extent block (legal even if B % 8 != 0)
    half = _round_up(-(-B // 2), 8)       # ceil(B/2) rounded up to the sublane granule
    return max(8, min(block_b, half))


def decision_kernel(
    x_ref,                     # (TB, 230)  activations (any float dtype)
    w1_ref, b1_ref,            # (230, 128) compute dtype, (1, 128) f32   encoder layer 1
    w2_ref, b2_ref,            # (128, 64),               (1, 64)         encoder layer 2
    wh1_ref, bh1_ref,          # (64, 64),                (1, 64)         fused head layer 1
    wh2_ref, bh2_ref,          # (64, 8),                 (1, 8)          block-diag head layer 2
    out_ref,                   # (TB, 8) f32
):
    cd = w1_ref.dtype
    # Cast the activation tile to the matmul compute dtype in VMEM (VPU convert)
    # instead of an extra wrapper-side HBM pass over x.
    x = x_ref[...].astype(cd)

    # Hoist bias reads once.
    b1 = b1_ref[...]
    b2 = b2_ref[...]
    bh1 = bh1_ref[...]
    bh2 = bh2_ref[...]

    # ---- encoder: Linear(230->128) + ReLU, Linear(128->64) + ReLU (f32 accumulate) ----
    h1 = jnp.maximum(
        jnp.dot(x, w1_ref[...], preferred_element_type=jnp.float32) + b1, 0.0)
    h2 = jnp.maximum(
        jnp.dot(h1.astype(cd), w2_ref[...], preferred_element_type=jnp.float32) + b2, 0.0)

    # ---- fused heads ----
    # layer 1: [action_head.L1 | param_head.L1] in one (64,64) matmul + ReLU
    hh = jnp.maximum(
        jnp.dot(h2.astype(cd), wh1_ref[...], preferred_element_type=jnp.float32) + bh1, 0.0)
    # layer 2: block-diagonal (64,8) -> lanes 0:3 = action logits, 3:6 = params, 6:8 = 0
    y2 = jnp.dot(hh.astype(cd), wh2_ref[...], preferred_element_type=jnp.float32) + bh2

    col = lax.broadcasted_iota(jnp.int32, y2.shape, 1)
    is_logit = col < 3

    # masked softmax over the 3 logit lanes (exp(-inf) = 0 elsewhere), exact normalization
    masked = jnp.where(is_logit, y2, -jnp.inf)
    m = jnp.max(masked, axis=1, keepdims=True)
    e = jnp.exp(masked - m)
    s = jnp.sum(e, axis=1, keepdims=True)
    probs = e * pl.reciprocal(s)            # exact reciprocal; off the critical path

    # lanes 6:8 of y2 are exactly zero, so a single select packs the output slab
    out_ref[...] = jnp.where(is_logit, probs, y2)


def prepare_params(params, compute_dtype=jnp.bfloat16):
    """One-time packing / dtype prep of the module parameters for the kernel."""
    cd = compute_dtype
    wh1 = jnp.concatenate([params["wa1"], params["wp1"]], axis=1)          # (64, 64)
    bh1 = jnp.concatenate([params["ba1"], params["bp1"]], axis=1)          # (1, 64)
    wh2 = jnp.zeros((64, HEAD_OUT), jnp.float32)
    wh2 = wh2.at[0:32, 0:3].set(params["wa2"]).at[32:64, 3:6].set(params["wp2"])
    bh2 = jnp.zeros((1, HEAD_OUT), jnp.float32)
    bh2 = bh2.at[:, 0:3].set(params["ba2"]).at[:, 3:6].set(params["bp2"])
    return {
        "w1": params["w1"].astype(cd), "b1": params["b1"].astype(jnp.float32),
        "w2": params["w2"].astype(cd), "b2": params["b2"].astype(jnp.float32),
        "wh1": wh1.astype(cd),         "bh1": bh1.astype(jnp.float32),
        "wh2": wh2.astype(cd),         "bh2": bh2.astype(jnp.float32),
    }


def enhanced_decision_network(x, prepped, *, block_b=1024):
    """x: (B, 230) float. prepped: dict from prepare_params. Returns (probs, params)."""
    B, F = x.shape
    assert F == IN_FEATURES
    tb = _pick_batch_tile(B, block_b)
    grid = (pl.cdiv(B, tb),)

    batch_map = lambda i: (i, 0)     # x / out tiled over batch
    resident = lambda i: (0, 0)      # weights stay VMEM-resident across the grid

    out = pl.pallas_call(
        decision_kernel,
        out_shape=jax.ShapeDtypeStruct((B, HEAD_OUT), jnp.float32),
        grid=grid,
        in_specs=[
            pl.BlockSpec((tb, IN_FEATURES), batch_map),
            pl.BlockSpec((IN_FEATURES, 128), resident),
            pl.BlockSpec((1, 128), resident),
            pl.BlockSpec((128, 64), resident),
            pl.BlockSpec((1, 64), resident),
            pl.BlockSpec((64, 64), resident),
            pl.BlockSpec((1, 64), resident),
            pl.BlockSpec((64, HEAD_OUT), resident),
            pl.BlockSpec((1, HEAD_OUT), resident),
        ],
        out_specs=pl.BlockSpec((tb, HEAD_OUT), batch_map),
        compiler_params=pltpu.CompilerParams(
            dimension_semantics=("parallel",)),
    )(x, prepped["w1"], prepped["b1"], prepped["w2"], prepped["b2"],
      prepped["wh1"], prepped["bh1"], prepped["wh2"], prepped["bh2"])

    action_probs = out[:, 0:3]
    action_params = out[:, 3:6]
    return action_probs, action_params


def init_params(key):
    """Deterministic synthetic parameters matching the PyTorch module's shapes.

    Weights are stored as (in_features, out_features) = PyTorch weight^T.
    """
    dims = {
        "w1": (230, 128), "b1": (1, 128),
        "w2": (128, 64),  "b2": (1, 64),
        "wa1": (64, 32),  "ba1": (1, 32),
        "wa2": (32, 3),   "ba2": (1, 3),
        "wp1": (64, 32),  "bp1": (1, 32),
        "wp2": (32, 3),   "bp2": (1, 3),
    }
    params = {}
    keys = jax.random.split(key, len(dims))
    for k, (name, shape) in zip(keys, sorted(dims.items())):
        fan_in = shape[0] if name.startswith("w") else shape[1]
        scale = 1.0 / jnp.sqrt(jnp.float32(fan_in))
        params[name] = (
            jax.random.uniform(k, shape, jnp.float32, minval=-1.0, maxval=1.0) * scale
        )
    return params


def reference_forward(x, p):
    """Pure-JAX reference of the PyTorch forward pass (unfused, f32)."""
    h = jnp.maximum(x @ p["w1"] + p["b1"], 0.0)
    h = jnp.maximum(h @ p["w2"] + p["b2"], 0.0)
    a = jnp.maximum(h @ p["wa1"] + p["ba1"], 0.0)
    logits = a @ p["wa2"] + p["ba2"]
    probs = jax.nn.softmax(logits, axis=1)
    q = jnp.maximum(h @ p["wp1"] + p["bp1"], 0.0)
    out_params = q @ p["wp2"] + p["bp2"]
    return probs, out_params


if __name__ == "__main__":
    key = jax.random.PRNGKey(0)
    k_x, k_p = jax.random.split(key)

    params = init_params(k_p)
    fwd = jax.jit(enhanced_decision_network)

    # --- f32 compute path, small batch, single grid step ---
    B = 8
    x = jax.random.normal(k_x, (B, IN_FEATURES), dtype=jnp.float32)
    prepped_f32 = prepare_params(params, compute_dtype=jnp.float32)
    probs, out_params = fwd(x, prepped_f32)
    jax.block_until_ready((probs, out_params))

    ref_probs, ref_params = reference_forward(x, params)
    assert jnp.allclose(probs, ref_probs, atol=2e-2, rtol=2e-2)
    assert jnp.allclose(out_params, ref_params, atol=2e-2, rtol=2e-2)
    assert jnp.allclose(jnp.sum(probs, axis=1), 1.0, atol=1e-3)

    # --- bf16 matmul path, 2-step grid with a partial boundary block ---
    B2 = 20
    x2 = jax.random.normal(k_x, (B2, IN_FEATURES), dtype=jnp.float32)
    prepped_bf16 = prepare_params(params, compute_dtype=jnp.bfloat16)
    probs2, out_params2 = fwd(x2, prepped_bf16)
    jax.block_until_ready((probs2, out_params2))

    ref_probs2, ref_params2 = reference_forward(x2, params)
    assert jnp.allclose(probs2, ref_probs2, atol=3e-2, rtol=3e-2)
    assert jnp.allclose(out_params2, ref_params2, atol=3e-2, rtol=3e-2)
    assert jnp.allclose(jnp.sum(probs2, axis=1), 1.0, atol=1e-3)

    print("KERNEL_OK")
</pallas_src>

<mosaic_0001>
module attributes {stable_mosaic.version = 11 : i64} {
  func.func @decision_kernel(%arg0: i32, %arg1: memref<8x230xf32, #tpu.memory_space<vmem>>, %arg2: memref<230x128xf32, #tpu.memory_space<vmem>>, %arg3: memref<1x128xf32, #tpu.memory_space<vmem>>, %arg4: memref<128x64xf32, #tpu.memory_space<vmem>>, %arg5: memref<1x64xf32, #tpu.memory_space<vmem>>, %arg6: memref<64x64xf32, #tpu.memory_space<vmem>>, %arg7: memref<1x64xf32, #tpu.memory_space<vmem>>, %arg8: memref<64x8xf32, #tpu.memory_space<vmem>>, %arg9: memref<1x8xf32, #tpu.memory_space<vmem>>, %arg10: memref<8x8xf32, #tpu.memory_space<vmem>>) attributes {dimension_semantics = [#tpu.dimension_semantics<parallel>], iteration_bounds = array<i64: 1>, scalar_prefetch = 0 : i64, scratch_operands = 0 : i64, tpu.core_type = #tpu.core_type<tc>, window_params = [{transform_indices = @transform_0, window_bounds = array<i64: 8, 230>}, {pipeline_mode = #tpu.pipeline_mode<synchronous>, transform_indices = @transform_1, window_bounds = array<i64: 230, 128>}, {pipeline_mode = #tpu.pipeline_mode<synchronous>, transform_indices = @transform_2, window_bounds = array<i64: 1, 128>}, {pipeline_mode = #tpu.pipeline_mode<synchronous>, transform_indices = @transform_3, window_bounds = array<i64: 128, 64>}, {pipeline_mode = #tpu.pipeline_mode<synchronous>, transform_indices = @transform_4, window_bounds = array<i64: 1, 64>}, {pipeline_mode = #tpu.pipeline_mode<synchronous>, transform_indices = @transform_5, window_bounds = array<i64: 64, 64>}, {pipeline_mode = #tpu.pipeline_mode<synchronous>, transform_indices = @transform_6, window_bounds = array<i64: 1, 64>}, {pipeline_mode = #tpu.pipeline_mode<synchronous>, transform_indices = @transform_7, window_bounds = array<i64: 64, 8>}, {pipeline_mode = #tpu.pipeline_mode<synchronous>, transform_indices = @transform_8, window_bounds = array<i64: 1, 8>}, {transform_indices = @transform_9, window_bounds = array<i64: 8, 8>}]} {
    %c0 = arith.constant 0 : index
    %c0_0 = arith.constant 0 : index
    %0 = vector.load %arg1[%c0, %c0_0] : memref<8x230xf32, #tpu.memory_space<vmem>>, vector<8x230xf32>
    %c0_1 = arith.constant 0 : index
    %c0_2 = arith.constant 0 : index
    %1 = vector.load %arg3[%c0_1, %c0_2] : memref<1x128xf32, #tpu.memory_space<vmem>>, vector<1x128xf32>
    %c0_3 = arith.constant 0 : index
    %c0_4 = arith.constant 0 : index
    %2 = vector.load %arg5[%c0_3, %c0_4] : memref<1x64xf32, #tpu.memory_space<vmem>>, vector<1x64xf32>
    %c0_5 = arith.constant 0 : index
    %c0_6 = arith.constant 0 : index
    %3 = vector.load %arg7[%c0_5, %c0_6] : memref<1x64xf32, #tpu.memory_space<vmem>>, vector<1x64xf32>
    %c0_7 = arith.constant 0 : index
    %c0_8 = arith.constant 0 : index
    %4 = vector.load %arg9[%c0_7, %c0_8] : memref<1x8xf32, #tpu.memory_space<vmem>>, vector<1x8xf32>
    %c0_9 = arith.constant 0 : index
    %c0_10 = arith.constant 0 : index
    %5 = vector.load %arg2[%c0_9, %c0_10] : memref<230x128xf32, #tpu.memory_space<vmem>>, vector<230x128xf32>
    %cst = arith.constant dense<0.000000e+00> : vector<8x128xf32>
    %6 = tpu.matmul %0, %5, %cst {dimension_numbers = #tpu.dot_dimension_numbers<[1], [0], [0], [1], [0, 0, 1, 1], [], []>} : vector<8x230xf32>, vector<230x128xf32>, vector<8x128xf32> -> vector<8x128xf32>
    %7 = vector.broadcast %1 : vector<1x128xf32> to vector<8x128xf32>
    %8 = arith.addf %6, %7 : vector<8x128xf32>
    %cst_11 = arith.constant 0.000000e+00 : f32
    %9 = vector.broadcast %cst_11 : f32 to vector<8x128xf32>
    %10 = arith.maximumf %8, %9 : vector<8x128xf32>
    %c0_12 = arith.constant 0 : index
    %c0_13 = arith.constant 0 : index
    %11 = vector.load %arg4[%c0_12, %c0_13] : memref<128x64xf32, #tpu.memory_space<vmem>>, vector<128x64xf32>
    %cst_14 = arith.constant dense<0.000000e+00> : vector<8x64xf32>
    %12 = tpu.matmul %10, %11, %cst_14 {dimension_numbers = #tpu.dot_dimension_numbers<[1], [0], [0], [1], [0, 0, 1, 1], [], []>} : vector<8x128xf32>, vector<128x64xf32>, vector<8x64xf32> -> vector<8x64xf32>
    %13 = vector.broadcast %2 : vector<1x64xf32> to vector<8x64xf32>
    %14 = arith.addf %12, %13 : vector<8x64xf32>
    %cst_15 = arith.constant 0.000000e+00 : f32
    %15 = vector.broadcast %cst_15 : f32 to vector<8x64xf32>
    %16 = arith.maximumf %14, %15 : vector<8x64xf32>
    %c0_16 = arith.constant 0 : index
    %c0_17 = arith.constant 0 : index
    %17 = vector.load %arg6[%c0_16, %c0_17] : memref<64x64xf32, #tpu.memory_space<vmem>>, vector<64x64xf32>
    %cst_18 = arith.constant dense<0.000000e+00> : vector<8x64xf32>
    %18 = tpu.matmul %16, %17, %cst_18 {dimension_numbers = #tpu.dot_dimension_numbers<[1], [0], [0], [1], [0, 0, 1, 1], [], []>} : vector<8x64xf32>, vector<64x64xf32>, vector<8x64xf32> -> vector<8x64xf32>
    %19 = vector.broadcast %3 : vector<1x64xf32> to vector<8x64xf32>
    %20 = arith.addf %18, %19 : vector<8x64xf32>
    %cst_19 = arith.constant 0.000000e+00 : f32
    %21 = vector.broadcast %cst_19 : f32 to vector<8x64xf32>
    %22 = arith.maximumf %20, %21 : vector<8x64xf32>
    %c0_20 = arith.constant 0 : index
    %c0_21 = arith.constant 0 : index
    %23 = vector.load %arg8[%c0_20, %c0_21] : memref<64x8xf32, #tpu.memory_space<vmem>>, vector<64x8xf32>
    %cst_22 = arith.constant dense<0.000000e+00> : vector<8x8xf32>
    %24 = tpu.matmul %22, %23, %cst_22 {dimension_numbers = #tpu.dot_dimension_numbers<[1], [0], [0], [1], [0, 0, 1, 1], [], []>} : vector<8x64xf32>, vector<64x8xf32>, vector<8x8xf32> -> vector<8x8xf32>
    %25 = vector.broadcast %4 : vector<1x8xf32> to vector<8x8xf32>
    %26 = arith.addf %24, %25 : vector<8x8xf32>
    %27 = tpu.iota {dimensions = array<i32: 1>} : vector<8x8xi32>
    %c3_i32 = arith.constant 3 : i32
    %28 = vector.broadcast %c3_i32 : i32 to vector<8x8xi32>
    %29 = arith.cmpi slt, %27, %28 : vector<8x8xi32>
    %cst_23 = arith.constant 0xFF800000 : f32
    %30 = vector.broadcast %cst_23 : f32 to vector<8x8xf32>
    %31 = arith.select %29, %26, %30 : vector<8x8xi1>, vector<8x8xf32>
    %cst_24 = arith.constant dense<0xFF800000> : vector<8xf32>
    %32 = vector.multi_reduction <maximumf>, %31, %cst_24 [1] : vector<8x8xf32> to vector<8xf32>
    %33 = vector.shape_cast %32 : vector<8xf32> to vector<8x1xf32>
    %34 = vector.broadcast %33 : vector<8x1xf32> to vector<8x8xf32>
    %35 = arith.subf %31, %34 : vector<8x8xf32>
    %36 = math.exp %35 : vector<8x8xf32>
    %cst_25 = arith.constant dense<0.000000e+00> : vector<8xf32>
    %37 = vector.multi_reduction <add>, %36, %cst_25 [1] : vector<8x8xf32> to vector<8xf32>
    %38 = vector.shape_cast %37 : vector<8xf32> to vector<8x1xf32>
    %39 = tpu.reciprocal %38 : vector<8x1xf32> -> vector<8x1xf32>
    %40 = vector.broadcast %39 : vector<8x1xf32> to vector<8x8xf32>
    %41 = arith.mulf %36, %40 : vector<8x8xf32>
    %42 = arith.select %29, %41, %26 : vector<8x8xi1>, vector<8x8xf32>
    %c0_26 = arith.constant 0 : index
    %c0_27 = arith.constant 0 : index
    %43 = vector.load %arg10[%c0_26, %c0_27] : memref<8x8xf32, #tpu.memory_space<vmem>>, vector<8x8xf32>
    tpu.vector_store %arg10[%c0_26, %c0_27], %42 {strides = array<i32>} : memref<8x8xf32, #tpu.memory_space<vmem>>, vector<8x8xf32>,
    return
  }
  func.func @transform_0(%arg0: i32) -> (i32, i32) {
    %c0_i32 = arith.constant 0 : i32
    %c0_i32_0 = arith.constant 0 : i32
    return %arg0, %c0_i32 : i32, i32
  }
  func.func @transform_1(%arg0: i32) -> (i32, i32) {
    %c0_i32 = arith.constant 0 : i32
    %c0_i32_0 = arith.constant 0 : i32
    %c0_i32_1 = arith.constant 0 : i32
    return %c0_i32, %c0_i32_0 : i32, i32
  }
  func.func @transform_2(%arg0: i32) -> (i32, i32) {
    %c0_i32 = arith.constant 0 : i32
    %c0_i32_0 = arith.constant 0 : i32
    %c0_i32_1 = arith.constant 0 : i32
    return %c0_i32, %c0_i32_0 : i32, i32
  }
  func.func @transform_3(%arg0: i32) -> (i32, i32) {
    %c0_i32 = arith.constant 0 : i32
    %c0_i32_0 = arith.constant 0 : i32
    %c0_i32_1 = arith.constant 0 : i32
    return %c0_i32, %c0_i32_0 : i32, i32
  }
  func.func @transform_4(%arg0: i32) -> (i32, i32) {
    %c0_i32 = arith.constant 0 : i32
    %c0_i32_0 = arith.constant 0 : i32
    %c0_i32_1 = arith.constant 0 : i32
    return %c0_i32, %c0_i32_0 : i32, i32
  }
  func.func @transform_5(%arg0: i32) -> (i32, i32) {
    %c0_i32 = arith.constant 0 : i32
    %c0_i32_0 = arith.constant 0 : i32
    %c0_i32_1 = arith.constant 0 : i32
    return %c0_i32, %c0_i32_0 : i32, i32
  }
  func.func @transform_6(%arg0: i32) -> (i32, i32) {
    %c0_i32 = arith.constant 0 : i32
    %c0_i32_0 = arith.constant 0 : i32
    %c0_i32_1 = arith.constant 0 : i32
    return %c0_i32, %c0_i32_0 : i32, i32
  }
  func.func @transform_7(%arg0: i32) -> (i32, i32) {
    %c0_i32 = arith.constant 0 : i32
    %c0_i32_0 = arith.constant 0 : i32
    %c0_i32_1 = arith.constant 0 : i32
    return %c0_i32, %c0_i32_0 : i32, i32
  }
  func.func @transform_8(%arg0: i32) -> (i32, i32) {
    %c0_i32 = arith.constant 0 : i32
    %c0_i32_0 = arith.constant 0 : i32
    %c0_i32_1 = arith.constant 0 : i32
    return %c0_i32, %c0_i32_0 : i32, i32
  }
  func.func @transform_9(%arg0: i32) -> (i32, i32) {
    %c0_i32 = arith.constant 0 : i32
    %c0_i32_0 = arith.constant 0 : i32
    return %arg0, %c0_i32 : i32, i32
  }
}

</mosaic_0001>

<bundles_post_ra>
// kernel: enhanced_decision_network.1
= control target key start
LH: loop header
LB: loop body
LE: loop exit
PB: predicated region body
PF: predicated region fallthrough
CT: control target
= control target key end

     0   :  { %14 = vsyncpa [#allocation3], 0  ;;  %s698_s30 = smov [#allocation2]   ;;  %s986_s0 = inlined_call_operand.vmem [shape: f32[8,230], index: 0, kind: input, shape index: {}]   ;;  %s987_s1 = inlined_call_operand.vmem [shape: f32[230,128], index: 1, kind: input, shape index: {}]   ;;  %s988_s2 = inlined_call_operand.vmem [shape: f32[1,128], index: 2, kind: input, shape index: {}]   ;;  %s989_s3 = inlined_call_operand.vmem [shape: f32[128,64], index: 3, kind: input, shape index: {}]   ;;  %s990_s4 = inlined_call_operand.vmem [shape: f32[1,64], index: 4, kind: input, shape index: {}]   ;;  %s991_s5 = inlined_call_operand.hbm [shape: f32[64,64], index: 5, kind: input, shape index: {}]   ;;  %s992_s6 = inlined_call_operand.vmem [shape: f32[1,64], index: 6, kind: input, shape index: {}]   ;;  %s993_s7 = inlined_call_operand.vmem [shape: f32[64,8], index: 7, kind: input, shape index: {}]   ;;  %s994_s8 = inlined_call_operand.vmem [shape: f32[1,8], index: 8, kind: input, shape index: {}]   ;;  %s995_s9 = inlined_call_operand.vmem [shape: f32[8,8], index: 9, kind: output, shape index: {}]  }
   0x1   :  { %s30_s10 = sshll.u32 %s698_s30, 4  ;;  %s674_s13 = scalar_lea.hbm %s991_s5, 1024  ;;  %s31_s10 = int_to_ptr.vmem [resolvable:$true] %s30_s10 }
   0x2   :  { %p675_p0 = scmp.ne.s32.totalorder %s991_s5, %s674_s13  ;;  %p678_p1 = scmp.lt.u32.totalorder %s674_s13, %s991_s5 }
   0x4   :  { %p680_p2 = pnand %p678_p1, %p675_p0 }
   0x6   :  { %683 = shalt.err (!%p680_p2)
}
   0x7   :  { %s684_s18 = scalar_lea.vmem %s31_s10, 1024  ;;  %p689_p4 = scmp.lt.s32.totalorder %s31_s10, %s31_s10 }
   0x8   :  { %p685_p3 = scmp.ne.s32.totalorder %s31_s10, %s684_s18  ;;  %p690_p5 = scmp.lt.s32.totalorder %s684_s18, %s684_s18 }
   0xa   :  { %p691_p6 = por %p690_p5, %p689_p4 }
   0xc   :  { %p692_p7 = pnand %p691_p6, %p685_p3 }
   0xe   :  { %695 = shalt.err (!%p692_p7)
}
   0xf   :  { %s699_s19 = smov 128   ;;  %s700_s20 = smov 8  }
  0x10   :  { %36 = dma.hbm_to_vmem [thread:$0]  %s991_s5, 1024, %s31_s10, [#allocation3], %s699_s19, %s699_s19, %s700_s20  }
  0x11   :  { %696 = dma.done.wait [#allocation3], 1024  }
  0x12   :  { %697 = vsyncadd [#allocation3], 4294966272  ;;  %v701_v0 = vmov 0.0|0.0   ;;  %v52_v1 = vld [vmem:[%s987_s1] sm:$0xff]  ;;  %v53_v2 = vld [vmem:[%s987_s1 + $0x8] sm:$0xff]  ;;  %vm87_vm0 = vcmask 834560  }
  0x13   :  { %574 = vmatprep.subr.bf16.mxu0 %v701_v0  ;;  %616 = vmatprep.subr.bf16.mxu1 %v701_v0  ;;  %v54_v3 = vld [vmem:[%s987_s1 + $0x10] sm:$0xff]  ;;  %v575_v4 = vpack.c.bf16 %v53_v2, %v52_v1  ;;  %v55_v5 = vld [vmem:[%s987_s1 + $0x18] sm:$0xff]  ;;  %v56_v7 = vld [vmem:[%s987_s1 + $0x20] sm:$0xff]  ;;  %v702_v2 = vmov 0.0   ;;  %vm91_vm1 = vcmask 1045504   ;;  %vm703_vm2 = vmmov 0  }
  0x14   :  { %v578_v6 = vpack.c.bf16 %v55_v5, %v54_v3  ;;  %v57_v8 = vld [vmem:[%s987_s1 + $0x28] sm:$0xff]  ;;  %v58_v10 = vld [vmem:[%s987_s1 + $0x30] sm:$0xff]  ;;  %v59_v11 = vld [vmem:[%s987_s1 + $0x38] sm:$0xff]  ;;  %533 = vmatprep.mubr.msk.f32.mxu1 %vm703_vm2, %v702_v2  ;;  %vm273_vm3 = vcmask 523264   ;;  %vm439_vm5 = vcmask 64512  }
  0x15   :  { %576 = vmatpush1.bf16.msra.mxu0 %v575_v4  ;;  %v581_v9 = vpack.c.bf16 %v57_v8, %v56_v7  ;;  %v47_v12 = vld [vmem:[%s986_s0 + $0x8] sm:$0xff]  ;;  %v166_v13 = vld [vmem:[%s989_s3] sm:$0xff]  ;;  %v584_v15 = vpack.c.bf16 %v59_v11, %v58_v10  ;;  %v168_v17 = vld [vmem:[%s989_s3 + $0x10] sm:$0xff] }
  0x16   :  { %577 = vmatprep.subr.bf16.mxu0 %v701_v0  ;;  %460 = vmatprep.mubr.msk.f32.mxu0 %vm87_vm0, %v47_v12  ;;  %v167_v14 = vld [vmem:[%s989_s3 + $0x8] sm:$0xff]  ;;  %v169_v18 = vld [vmem:[%s989_s3 + $0x18] sm:$0xff]  ;;  %v60_v19 = vld [vmem:[%s987_s1 + $0x40] sm:$0xff] }
  0x17   :  { %v617_v16 = vpack.c.bf16 %v167_v14, %v166_v13  ;;  %v61_v20 = vld [vmem:[%s987_s1 + $0x48] sm:$0xff]  ;;  %v620_v21 = vpack.c.bf16 %v169_v18, %v168_v17  ;;  %v170_v22 = vld [vmem:[%s989_s3 + $0x20] sm:$0xff]  ;;  %v62_v25 = vld [vmem:[%s987_s1 + $0x50] sm:$0xff] }
  0x18   :  { %v171_v23 = vld [vmem:[%s989_s3 + $0x28] sm:$0xff]  ;;  %v587_v24 = vpack.c.bf16 %v61_v20, %v60_v19  ;;  %v63_v26 = vld [vmem:[%s987_s1 + $0x58] sm:$0xff]  ;;  %v172_v28 = vld [vmem:[%s989_s3 + $0x30] sm:$0xff] }
  0x19   :  { %579 = vmatpush1.bf16.msra.mxu0 %v578_v6  ;;  %618 = vmatpush3.bf16.msra.mxu1 %v617_v16  ;;  %v623_v27 = vpack.c.bf16 %v171_v23, %v170_v22  ;;  %v173_v29 = vld [vmem:[%s989_s3 + $0x38] sm:$0xff]  ;;  %v590_v30 = vpack.c.bf16 %v63_v26, %v62_v25  ;;  %v64_v31 = vld [vmem:[%s987_s1 + $0x60] sm:$0xff]  ;;  %v65_v32 = vld [vmem:[%s987_s1 + $0x68] sm:$0xff] }
  0x1a   :  { %580 = vmatprep.subr.bf16.mxu0 %v701_v0  ;;  %619 = vmatprep.subr.bf16.mxu1 %v701_v0  ;;  %v626_v33 = vpack.c.bf16 %v173_v29, %v172_v28  ;;  %v174_v34 = vld [vmem:[%s989_s3 + $0x40] sm:$0xff]  ;;  %v175_v35 = vld [vmem:[%s989_s3 + $0x48] sm:$0xff]  ;;  %v593_v36 = vpack.c.bf16 %v65_v32, %v64_v31  ;;  %v66_v37 = vld [vmem:[%s987_s1 + $0x70] sm:$0xff] }
  0x1b   :  { %v67_v38 = vld [vmem:[%s987_s1 + $0x78] sm:$0xff]  ;;  %v629_v39 = vpack.c.bf16 %v175_v35, %v174_v34  ;;  %v176_v40 = vld [vmem:[%s989_s3 + $0x50] sm:$0xff]  ;;  %v68_v43 = vld [vmem:[%s987_s1 + $0x80] sm:$0xff] }
  0x1c   :  { %v177_v41 = vld [vmem:[%s989_s3 + $0x58] sm:$0xff]  ;;  %v596_v42 = vpack.c.bf16 %v67_v38, %v66_v37  ;;  %v69_v44 = vld [vmem:[%s987_s1 + $0x88] sm:$0xff]  ;;  %v178_v46 = vld [vmem:[%s989_s3 + $0x60] sm:$0xff] }
  0x1d   :  { %582 = vmatpush1.bf16.msra.mxu0 %v581_v9  ;;  %621 = vmatpush3.bf16.msra.mxu1 %v620_v21  ;;  %v632_v45 = vpack.c.bf16 %v177_v41, %v176_v40  ;;  %v179_v47 = vld [vmem:[%s989_s3 + $0x68] sm:$0xff]  ;;  %v599_v48 = vpack.c.bf16 %v69_v44, %v68_v43  ;;  %v70_v49 = vld [vmem:[%s987_s1 + $0x90] sm:$0xff]  ;;  %v71_v50 = vld [vmem:[%s987_s1 + $0x98] sm:$0xff] }
  0x1e   :  { %583 = vmatprep.subr.bf16.mxu0 %v701_v0  ;;  %622 = vmatprep.subr.bf16.mxu1 %v701_v0  ;;  %v635_v51 = vpack.c.bf16 %v179_v47, %v178_v46  ;;  %v602_v52 = vpack.c.bf16 %v71_v50, %v70_v49  ;;  %v72_v53 = vld [vmem:[%s987_s1 + $0xa0] sm:$0xff]  ;;  %v73_v54 = vld [vmem:[%s987_s1 + $0xa8] sm:$0xff]  ;;  %v74_v56 = vld [vmem:[%s987_s1 + $0xb0] sm:$0xff] }
  0x1f   :  { %v605_v55 = vpack.c.bf16 %v73_v54, %v72_v53  ;;  %v75_v57 = vld [vmem:[%s987_s1 + $0xb8] sm:$0xff]  ;;  %v76_v59 = vld [vmem:[%s987_s1 + $0xc0] sm:$0xff]  ;;  %v77_v60 = vld [vmem:[%s987_s1 + $0xc8] sm:$0xff] }
  0x20   :  { %v608_v58 = vpack.c.bf16 %v75_v57, %v74_v56  ;;  %v611_v61 = vpack.c.bf16 %v77_v60, %v76_v59  ;;  %v78_v62 = vld [vmem:[%s987_s1 + $0xd0] sm:$0xff]  ;;  %v79_v63 = vld [vmem:[%s987_s1 + $0xd8] sm:$0xff]  ;;  %v80_v3 = vld [vmem:[%s987_s1 + $0xe0] sm:$0x3f] }
  0x21   :  { %585 = vmatpush1.bf16.msra.mxu0 %v584_v15  ;;  %624 = vmatpush3.bf16.msra.mxu1 %v623_v27  ;;  %v614_v1 = vpack.c.bf16 %v79_v63, %v78_v62  ;;  %v46_v4 = vld [vmem:[%s986_s0] sm:$0xff]  ;;  %v180_v5 = vld [vmem:[%s989_s3 + $0x70] sm:$0xff]  ;;  %v181_v6 = vld [vmem:[%s989_s3 + $0x78] sm:$0xff] }
  0x22   :  { %586 = vmatprep.subr.bf16.mxu0 %v701_v0  ;;  %625 = vmatprep.subr.bf16.mxu1 %v701_v0  ;;  %v638_v7 = vpack.c.bf16 %v181_v6, %v180_v5  ;;  %v458_v8 = vld [vmem:[%s988_s2] ss:$0 sm:$0xff]  ;;  %v260_v10 = vld [vmem:[#allocation2 + $0x8] sm:$0xff]  ;;  %v261_v16 = vld [vmem:[#allocation2 + $0x10] sm:$0xff] }
  0x23   :  { %v259_v9 = vld [vmem:[#allocation2] sm:$0xff]  ;;  %v262_v17 = vld [vmem:[#allocation2 + $0x18] sm:$0xff]  ;;  %v264_v20 = vld [vmem:[#allocation2 + $0x28] sm:$0xff] }
  0x24   :  { %v641_v14 = vpack.c.bf16 %v260_v10, %v259_v9  ;;  %v644_v18 = vpack.c.bf16 %v262_v17, %v261_v16  ;;  %v263_v19 = vld [vmem:[#allocation2 + $0x20] sm:$0xff]  ;;  %v265_v22 = vld [vmem:[#allocation2 + $0x30] sm:$0xff]  ;;  %v266_v23 = vld [vmem:[#allocation2 + $0x38] sm:$0xff] }
  0x25   :  { %588 = vmatpush1.bf16.msra.mxu0 %v587_v24  ;;  %627 = vmatpush3.bf16.msra.mxu1 %v626_v33  ;;  %v647_v21 = vpack.c.bf16 %v264_v20, %v263_v19  ;;  %v650_v24 = vpack.c.bf16 %v266_v23, %v265_v22  ;;  %v461_v25 = vld [vmem:[%s990_s4] ss:$0 sm:$0xff]  ;;  %v349_v27 = vld [vmem:[%s993_s7 + $0x8] sm:$0xff]  ;;  %v350_v33 = vld [vmem:[%s993_s7 + $0x10] sm:$0xff] }
  0x26   :  { %589 = vmatprep.subr.bf16.mxu0 %v701_v0  ;;  %628 = vmatprep.subr.bf16.mxu1 %v701_v0  ;;  %v348_v26 = vld [vmem:[%s993_s7] sm:$0xff]  ;;  %v351_v34 = vld [vmem:[%s993_s7 + $0x18] sm:$0xff]  ;;  %v353_v37 = vld [vmem:[%s993_s7 + $0x28] sm:$0xff] }
  0x27   :  { %v653_v31 = vpack.c.bf16 %v349_v27, %v348_v26  ;;  %v656_v35 = vpack.c.bf16 %v351_v34, %v350_v33  ;;  %v355_v40 = vld [vmem:[%s993_s7 + $0x38] sm:$0xff] }
  0x29   :  { %591 = vmatpush1.bf16.msra.mxu0 %v590_v30  ;;  %630 = vmatpush3.bf16.msra.mxu1 %v629_v39  ;;  %v354_v39 = vld [vmem:[%s993_s7 + $0x30] sm:$0xff] }
  0x2a   :  { %592 = vmatprep.subr.bf16.mxu0 %v701_v0  ;;  %631 = vmatprep.subr.bf16.mxu1 %v701_v0  ;;  %v662_v41 = vpack.c.bf16 %v355_v40, %v354_v39 }
  0x2d   :  { %594 = vmatpush1.bf16.msra.mxu0 %v593_v36  ;;  %633 = vmatpush3.bf16.msra.mxu1 %v632_v45  ;;  %v352_v36 = vld [vmem:[%s993_s7 + $0x20] sm:$0xff] }
  0x2e   :  { %595 = vmatprep.subr.bf16.mxu0 %v701_v0  ;;  %634 = vmatprep.subr.bf16.mxu1 %v701_v0  ;;  %v659_v38 = vpack.c.bf16 %v353_v37, %v352_v36 }
  0x31   :  { %597 = vmatpush1.bf16.msra.mxu0 %v596_v42  ;;  %636 = vmatpush3.bf16.msra.mxu1 %v635_v51  ;;  %v462_v42 = vld [vmem:[%s992_s6] ss:$0 sm:$0xff] }
  0x32   :  { %598 = vmatprep.subr.bf16.mxu0 %v701_v0  ;;  %637 = vmatprep.subr.bf16.mxu1 %v701_v0 }
  0x35   :  { %600 = vmatpush1.bf16.msra.mxu0 %v599_v48  ;;  %639 = vmatpush3.bf16.msra.mxu1 %v638_v7  ;;  %v464_v48 = vld [vmem:[%s994_s8] ss:$0 sm:$0xff] }
  0x36   :  { %601 = vmatprep.subr.bf16.mxu0 %v701_v0  ;;  %640 = vmatprep.subr.bf16.mxu1 %v701_v0 }
  0x39   :  { %603 = vmatpush1.bf16.msra.mxu0 %v602_v52 }
  0x3a   :  { %604 = vmatprep.subr.bf16.mxu0 %v701_v0 }
  0x3d   :  { %606 = vmatpush1.bf16.msra.mxu0 %v605_v55 }
  0x3e   :  { %607 = vmatprep.subr.bf16.mxu0 %v701_v0 }
  0x41   :  { %609 = vmatpush1.bf16.msra.mxu0 %v608_v58 }
  0x42   :  { %610 = vmatprep.subr.bf16.mxu0 %v701_v0 }
  0x45   :  { %612 = vmatpush1.bf16.msra.mxu0 %v611_v61 }
  0x46   :  { %613 = vmatprep.subr.bf16.mxu0 %v701_v0 }
  0x49   :  { %615 = vmatpush1.bf16.msra.mxu0 %v614_v1 }
  0x4a   :  { %151 = vmatprep.subr.mxu0 %v702_v2 }
  0x4d   :  { %459 = vmatpush1.msk.msra.mxu0 %vm91_vm1, %v80_v3 }
  0x4e   :  { %160 = vmatmul.mubr.f32.vlgmr.msra.gmra.mrb[0].mxu0 %v46_v4 }
 0x121   :  { %v161_v11 = vpop.f32.mrb[0].mxu0 }
 0x122   :  { %v162_v12 = vadd.f32 %v458_v8, %v161_v11  ;;  %v163_v13 = vpop.f32.mrb[1].mxu0 }
 0x124   :  { %v165_v15 = vmax.f32 %v162_v12, 0.0 }
 0x126   :  { %534 = vmatmul.mubr.f32.vlgmr.msra.gmra.mrb[0].mxu1 %v165_v15 }
 0x127   :  { %642 = vmatpush3.bf16.msra.mxu1 %v641_v14  ;;  %552 = vmatprep.mubr.msk.f32.mxu1 %vm703_vm2, %v702_v2 }
 0x128   :  { %643 = vmatprep.subr.bf16.mxu1 %v701_v0 }
 0x12b   :  { %645 = vmatpush3.bf16.msra.mxu1 %v644_v18 }
 0x12c   :  { %646 = vmatprep.subr.bf16.mxu1 %v701_v0 }
 0x12f   :  { %648 = vmatpush3.bf16.msra.mxu1 %v647_v21 }
 0x130   :  { %649 = vmatprep.subr.bf16.mxu1 %v701_v0 }
 0x133   :  { %651 = vmatpush3.bf16.msra.mxu1 %v650_v24 }
 0x134   :  { %652 = vmatprep.subr.bf16.mxu1 %v701_v0 }
 0x1f9   :  { %v254_v28 = vpop.f32.mrb[0].mxu1 }
 0x1fa   :  { %v255_v29 = vadd.f32 %v461_v25, %v254_v28  ;;  %v535_v30 = vpop.f32.mrb[1].mxu1 }
 0x1fc   :  { %v258_v32 = vmax.f32 %v255_v29, 0.0 }
 0x1fe   :  { %553 = vmatmul.mubr.msk.f32.vlgmr.msra.gmra.mrb[2].mxu1 %vm273_vm3, %v258_v32 }
 0x1ff   :  { %654 = vmatpush3.bf16.msra.mxu1 %v653_v31  ;;  %571 = vmatprep.mubr.msk.f32.mxu1 %vm703_vm2, %v702_v2 }
 0x200   :  { %655 = vmatprep.subr.bf16.mxu1 %v701_v0 }
 0x203   :  { %657 = vmatpush3.bf16.msra.mxu1 %v656_v35 }
 0x204   :  { %658 = vmatprep.subr.bf16.mxu1 %v701_v0 }
 0x207   :  { %660 = vmatpush3.bf16.msra.mxu1 %v659_v38 }
 0x208   :  { %661 = vmatprep.subr.bf16.mxu1 %v701_v0  ;;  %v435_v0 = vlaneseq }
 0x20a   :  { %v436_v47 = vand.u32 127, %v435_v0 }
 0x20b   :  { %663 = vmatpush3.bf16.msra.mxu1 %v662_v41 }
 0x20c   :  { %vm437_vm4 = vcmp.lt.s32.totalorder %v436_v47, 3 }
 0x2d1   :  { %v343_v43 = vpop.f32.mrb[2].mxu1 }
 0x2d2   :  { %v344_v44 = vadd.f32 %v462_v42, %v343_v43  ;;  %v554_v45 = vpop.f32.mrb[3].mxu1 }
 0x2d4   :  { %v347_v46 = vmax.f32 %v344_v44, 0.0 }
 0x2d6   :  { %572 = vmatmul.mubr.msk.f32.vlgmr.msra.gmra.mrb[4].mxu1 %vm273_vm3, %v347_v46 }
 0x3a9   :  { %v431_v49 = vpop.f32.mrb[4].mxu1 }
 0x3aa   :  { %v432_v50 = vadd.f32 %v464_v48, %v431_v49  ;;  %v573_v51 = vpop.f32.mrb[5].mxu1 }
 0x3ac   :  { %v438_v52 = vsel %vm437_vm4, %v432_v50, -inf }
 0x3ad   :  { %v440_v53 = vsel %vm439_vm5, %v438_v52, -inf }
 0x3ae   :  { %441 = vmax.xlane.f32.xlu0 %v440_v53 }
 0x43b   :  { %v442_v54 = vpop.xlane.xlu0 %441 }
 0x43c   :  { %v443_v55 = vsub.f32 %v438_v52, %v442_v54 }
 0x43e   :  { %v444_v56 = vmul.f32 1.442695, %v443_v55 }
 0x440   :  { %670 = vpow2.f32 %v444_v56 }
 0x44a   :  { %v671_v57 = vpop.eup %670 }
 0x44b   :  { %v446_v58 = vsel %vm439_vm5, %v671_v57, 0.0 }
 0x44c   :  { %447 = vadd.xlane.f32.xlu0 %v446_v58 }
 0x4d9   :  { %v448_v59 = vpop.xlane.xlu0 %447 }
 0x4da   :  { %672 = vrcp.f32 %v448_v59 }
 0x4e4   :  { %v673_v60 = vpop.eup %672 }
 0x4e5   :  { %v450_v61 = vmul.f32 %v673_v60, %v671_v57 }
 0x4e7   :  { %v451_v62 = vsel %vm437_vm4, %v450_v61, %v432_v50 }
 0x4e8   :  { %452 = vst.msk [vmem:[%s995_s9] sm:$0xff] %vm439_vm5, %v451_v62 }
 0x4e9   :  { %457 = vsyncpa [#allocation3], 1 }

</bundles_post_ra>
